<compile_context>
chip_gen: v5e
topology: v5e:2x2
jax: 0.10.0
libtpu: 0.0.40
codegen_flags: <defaults>
</compile_context>

<pallas_src>
import jax
import jax.numpy as jnp
from jax.experimental import pallas as pl
from jax.experimental.pallas import tpu as pltpu

# self.iou_threshold / self.low_bg_iou are referenced but never set in the
# reference __init__; use standard Faster-RCNN values.
IOU_THRESHOLD = 0.5
LOW_BG_IOU = 0.1

TILE_P_RESIDENT = 128   # proposal tile for the resident-w6 path
TILE_P_KTILED = 256     # proposal tile for the K-tiled fallback path
MAX_TILE_K = 1792       # divides Din=12544 (in_channels=256) exactly


def _round_up(x, m):
    return (x + m - 1) // m * m


def _pick_tile_k(d_in_pad, max_tile=MAX_TILE_K):
    """Largest 128-multiple <= max_tile that divides d_in_pad exactly."""
    best = 128
    t = 128
    while t <= min(d_in_pad, max_tile):
        if d_in_pad % t == 0:
            best = t
        t += 128
    return best


def _vmem_capacity_bytes(default=64 << 20):
    """Physical VMEM per core; conservative 64 MiB (v7x) fallback."""
    try:
        info = pltpu.get_tpu_info()
        cap = getattr(info, "vmem_capacity_bytes", None)
        if cap:
            return int(cap)
    except Exception:
        pass
    return default


def _resident_vmem_footprint(tile_p, d_in_pad, fc, n_out_pad):
    # Default pipelining double-buffers every operand (constant-index blocks
    # are DMA'd once but still allocated twice).
    w_bytes = 2 * 2 * (d_in_pad * fc + fc * fc + fc * n_out_pad)   # bf16 x 2 buf
    bias_bytes = 2 * 4 * (2 * fc + n_out_pad)
    x_bytes = 2 * 2 * tile_p * d_in_pad                            # bf16 x 2 buf
    out_bytes = 2 * 4 * tile_p * n_out_pad
    interm = 3 * 4 * tile_p * fc                                   # f32 h / drains
    return w_bytes + bias_bytes + x_bytes + out_bytes + interm


def _ktiled_vmem_footprint(tile_p, tile_k, fc, n_out_pad):
    w_bytes = 2 * 2 * (tile_k * fc + fc * fc + fc * n_out_pad)
    bias_bytes = 2 * 4 * (2 * fc + n_out_pad)
    x_bytes = 2 * 2 * tile_p * tile_k
    out_bytes = 2 * 4 * tile_p * n_out_pad
    acc_bytes = 4 * tile_p * fc
    interm = 3 * 4 * tile_p * fc
    return w_bytes + bias_bytes + x_bytes + out_bytes + acc_bytes + interm


# ----------------------------- Pallas kernels -----------------------------

def _iou_assign_kernel(b1_ref, b2t_ref, best_iou_ref, best_idx_ref):
    """IOU(gt (G,4), proposal slab^T (4,T)) fused with max/argmax over gt.

    Writes best_iou (1,T) f32 and best_idx (1,T) int32 (first-max index)."""
    b1 = b1_ref[...]            # (G, 4)
    b2t = b2t_ref[...]          # (4, T)
    area1 = (b1[:, 2:3] - b1[:, 0:1]) * (b1[:, 3:4] - b1[:, 1:2])        # (G, 1)
    area2 = (b2t[2:3, :] - b2t[0:1, :]) * (b2t[3:4, :] - b2t[1:2, :])    # (1, T)
    x_left = jnp.maximum(b1[:, 0:1], b2t[0:1, :])                        # (G, T)
    y_top = jnp.maximum(b1[:, 1:2], b2t[1:2, :])
    x_right = jnp.minimum(b1[:, 2:3], b2t[2:3, :])
    y_bottom = jnp.minimum(b1[:, 3:4], b2t[3:4, :])
    inter = jnp.maximum(x_right - x_left, 0.0) * jnp.maximum(y_bottom - y_top, 0.0)
    union = area1 + area2 - inter
    iou = inter / jnp.maximum(union, 1e-9)                               # eps guard
    best = jnp.max(iou, axis=0, keepdims=True)                           # (1, T)
    gidx = jax.lax.broadcasted_iota(jnp.int32, iou.shape, 0).astype(jnp.float32)
    cand = jnp.where(iou >= best, gidx, jnp.float32(1e9))
    best_iou_ref[...] = best
    best_idx_ref[...] = jnp.min(cand, axis=0, keepdims=True).astype(jnp.int32)


def _head_kernel_resident(x_ref, w6_ref, b6_ref, w7_ref, b7_ref, wcb_ref, bcb_ref,
                          out_ref):
    """fc6 -> ReLU -> fc7 -> ReLU -> fused cls+box; w6 fully resident."""
    h = jnp.dot(x_ref[...], w6_ref[...], preferred_element_type=jnp.float32)
    h = jnp.maximum(h + b6_ref[...], 0.0).astype(jnp.bfloat16)
    h = jnp.dot(h, w7_ref[...], preferred_element_type=jnp.float32) + b7_ref[...]
    h = jnp.maximum(h, 0.0).astype(jnp.bfloat16)
    out_ref[...] = (jnp.dot(h, wcb_ref[...], preferred_element_type=jnp.float32)
                    + bcb_ref[...])


def _head_kernel_ktiled(x_ref, w6_ref, b6_ref, w7_ref, b7_ref, wcb_ref, bcb_ref,
                        out_ref, acc_ref):
    """fc6 (K-tiled, f32 accumulate) -> ReLU -> fc7 -> ReLU -> fused cls+box."""
    k = pl.program_id(1)

    @pl.when(k == 0)
    def _():
        acc_ref[...] = jnp.zeros_like(acc_ref)

    acc_ref[...] += jnp.dot(x_ref[...], w6_ref[...],
                            preferred_element_type=jnp.float32)

    @pl.when(k == pl.num_programs(1) - 1)
    def _():
        h = jnp.maximum(acc_ref[...] + b6_ref[...], 0.0).astype(jnp.bfloat16)
        h = jnp.dot(h, w7_ref[...], preferred_element_type=jnp.float32) + b7_ref[...]
        h = jnp.maximum(h, 0.0).astype(jnp.bfloat16)
        out_ref[...] = (jnp.dot(h, wcb_ref[...], preferred_element_type=jnp.float32)
                        + bcb_ref[...])


# ----------------------------- wrappers -----------------------------------

def iou_best_match(gt_boxes, proposals):
    """Returns (best_iou (P,), best_idx (P,)); tiled over the proposal axis."""
    p = proposals.shape[0]
    g = gt_boxes.shape[0]
    tile = min(512, _round_up(p, 128))
    p_pad = _round_up(p, tile)
    props_t = jnp.pad(proposals.astype(jnp.float32), ((0, p_pad - p), (0, 0))).T
    n_t = p_pad // tile

    best_iou, best_idx = pl.pallas_call(
        _iou_assign_kernel,
        out_shape=(jax.ShapeDtypeStruct((1, p_pad), jnp.float32),
                   jax.ShapeDtypeStruct((1, p_pad), jnp.int32)),
        grid_spec=pltpu.PrefetchScalarGridSpec(
            num_scalar_prefetch=0,
            grid=(n_t,),
            in_specs=[pl.BlockSpec((g, 4), lambda i: (0, 0)),      # gt resident
                      pl.BlockSpec((4, tile), lambda i: (0, i))],  # proposal slab
            out_specs=(pl.BlockSpec((1, tile), lambda i: (0, i)),
                       pl.BlockSpec((1, tile), lambda i: (0, i))),
        ),
        compiler_params=pltpu.CompilerParams(dimension_semantics=("parallel",)),
    )(gt_boxes.astype(jnp.float32), props_t)
    return best_iou[0, :p], best_idx[0, :p]


def assign_target_to_proposals(proposals, gt_boxes, gt_labels):
    """Mirrors RIOHead.assign_target_to_proposals (IOU + best-match in Pallas)."""
    best_match_iou, best_match_gt_idx = iou_best_match(gt_boxes, proposals)
    background = (best_match_iou < IOU_THRESHOLD) & (best_match_iou >= LOW_BG_IOU)
    ignored = best_match_iou < LOW_BG_IOU
    best_match_gt_idx = jnp.where(background, -1, best_match_gt_idx)
    best_match_gt_idx = jnp.where(ignored, -2, best_match_gt_idx)
    clamped = jnp.clip(best_match_gt_idx, 0, None)
    matched_gt_boxes = gt_boxes[clamped]
    # TODO(synk): torch uses int64 labels; int32 is semantically equivalent here.
    labels = gt_labels[clamped].astype(jnp.int32)
    labels = jnp.where(background, 0, labels)
    labels = jnp.where(ignored, -1, labels)
    return labels, matched_gt_boxes


def init_params(key, num_classes, in_channels, pool_size=7, fc_inner_dim=1024):
    """Deterministic synthetic f32 parameters (weights stored as (in, out))."""
    d_in = in_channels * pool_size * pool_size
    ks = jax.random.split(key, 4)
    scale = 0.02
    return {
        "w6": scale * jax.random.normal(ks[0], (d_in, fc_inner_dim), jnp.float32),
        "b6": jnp.zeros((1, fc_inner_dim), jnp.float32),
        "w7": scale * jax.random.normal(ks[1], (fc_inner_dim, fc_inner_dim), jnp.float32),
        "b7": jnp.zeros((1, fc_inner_dim), jnp.float32),
        "wc": scale * jax.random.normal(ks[2], (fc_inner_dim, num_classes), jnp.float32),
        "bc": jnp.zeros((1, num_classes), jnp.float32),
        "wb": scale * jax.random.normal(ks[3], (fc_inner_dim, num_classes * 4), jnp.float32),
        "bb": jnp.zeros((1, num_classes * 4), jnp.float32),
    }


def prepare_head_params(params, num_classes):
    """One-time prep: bf16 cast, fuse cls+box weights, pad to tile multiples."""
    d_in, fc = params["w6"].shape
    d_in_pad = _round_up(d_in, 128)   # Din=12544 at production is already aligned
    n_out = 5 * num_classes
    n_out_pad = _round_up(n_out, 128)

    w6 = jnp.pad(params["w6"].astype(jnp.bfloat16), ((0, d_in_pad - d_in), (0, 0)))
    w7 = params["w7"].astype(jnp.bfloat16)
    wcb = jnp.concatenate([params["wc"], params["wb"]], axis=1).astype(jnp.bfloat16)
    wcb = jnp.pad(wcb, ((0, 0), (0, n_out_pad - n_out)))
    bcb = jnp.concatenate([params["bc"], params["bb"]], axis=1).astype(jnp.float32)
    bcb = jnp.pad(bcb, ((0, 0), (0, n_out_pad - n_out)))

    return {
        "w6": w6, "b6": params["b6"].astype(jnp.float32),
        "w7": w7, "b7": params["b7"].astype(jnp.float32),
        "wcb": wcb, "bcb": bcb,
        "d_in": d_in, "d_in_pad": d_in_pad,
        "fc": fc, "n_out_pad": n_out_pad,
        "num_classes": num_classes,
    }


def mlp_head(x_flat, hp, *, mode=None):
    """x_flat: (P, in_channels*49) f32 -> (cls_scores (P,C), box_preds (P,4C)).

    mode: None (auto by VMEM footprint), "resident", or "ktiled"."""
    p, d_in = x_flat.shape
    d_in_pad, fc, n_out_pad = hp["d_in_pad"], hp["fc"], hp["n_out_pad"]

    vmem_cap = _vmem_capacity_bytes()

    if mode is None:
        resident_fp = _resident_vmem_footprint(TILE_P_RESIDENT, d_in_pad, fc, n_out_pad)
        mode = "resident" if resident_fp <= 0.55 * vmem_cap else "ktiled"

    if mode == "resident":
        tile_p = TILE_P_RESIDENT
        footprint = _resident_vmem_footprint(tile_p, d_in_pad, fc, n_out_pad)
    else:
        tile_p = TILE_P_KTILED
        tile_k = _pick_tile_k(d_in_pad)
        footprint = _ktiled_vmem_footprint(tile_p, tile_k, fc, n_out_pad)

    p_pad = _round_up(p, tile_p)
    n_p = p_pad // tile_p
    if n_p > 1 and n_p % 2 == 1:   # keep both v7x TensorCores equally busy
        p_pad += tile_p
        n_p += 1

    # Pad rows (P) and (rarely) the contraction dim to tile multiples; cast bf16.
    x = jnp.pad(x_flat.astype(jnp.bfloat16),
                ((0, p_pad - p), (0, d_in_pad - d_in)))

    vmem_limit = int(min(max(footprint * 2, 32 << 20),
                         int(0.85 * vmem_cap), 100 << 20))

    if mode == "resident":
        cp = pltpu.CompilerParams(dimension_semantics=("parallel",),
                                  vmem_limit_bytes=vmem_limit)
        out = pl.pallas_call(
            _head_kernel_resident,
            out_shape=jax.ShapeDtypeStruct((p_pad, n_out_pad), jnp.float32),
            grid_spec=pltpu.PrefetchScalarGridSpec(
                num_scalar_prefetch=0,
                grid=(n_p,),
                in_specs=[
                    pl.BlockSpec((tile_p, d_in_pad), lambda i: (i, 0)),   # x tile
                    pl.BlockSpec((d_in_pad, fc), lambda i: (0, 0)),       # w6 resident
                    pl.BlockSpec((1, fc), lambda i: (0, 0)),              # b6
                    pl.BlockSpec((fc, fc), lambda i: (0, 0)),             # w7
                    pl.BlockSpec((1, fc), lambda i: (0, 0)),              # b7
                    pl.BlockSpec((fc, n_out_pad), lambda i: (0, 0)),      # wcb
                    pl.BlockSpec((1, n_out_pad), lambda i: (0, 0)),       # bcb
                ],
                out_specs=pl.BlockSpec((tile_p, n_out_pad), lambda i: (i, 0)),
            ),
            compiler_params=cp,
        )(x, hp["w6"], hp["b6"], hp["w7"], hp["b7"], hp["wcb"], hp["bcb"])
    else:
        n_k = d_in_pad // tile_k
        cp = pltpu.CompilerParams(dimension_semantics=("parallel", "arbitrary"),
                                  vmem_limit_bytes=vmem_limit)
        out = pl.pallas_call(
            _head_kernel_ktiled,
            out_shape=jax.ShapeDtypeStruct((p_pad, n_out_pad), jnp.float32),
            grid_spec=pltpu.PrefetchScalarGridSpec(
                num_scalar_prefetch=0,
                grid=(n_p, n_k),
                in_specs=[
                    pl.BlockSpec((tile_p, tile_k), lambda i, k: (i, k)),  # x tile
                    pl.BlockSpec((tile_k, fc), lambda i, k: (k, 0)),      # w6 K-slice
                    pl.BlockSpec((1, fc), lambda i, k: (0, 0)),           # b6
                    pl.BlockSpec((fc, fc), lambda i, k: (0, 0)),          # w7
                    pl.BlockSpec((1, fc), lambda i, k: (0, 0)),           # b7
                    pl.BlockSpec((fc, n_out_pad), lambda i, k: (0, 0)),   # wcb
                    pl.BlockSpec((1, n_out_pad), lambda i, k: (0, 0)),    # bcb
                ],
                out_specs=pl.BlockSpec((tile_p, n_out_pad), lambda i, k: (i, 0)),
                scratch_shapes=[pltpu.VMEM((tile_p, fc), jnp.float32)],   # fc6 acc
            ),
            compiler_params=cp,
        )(x, hp["w6"], hp["b6"], hp["w7"], hp["b7"], hp["wcb"], hp["bcb"])

    c = hp["num_classes"]
    cls_scores = out[:p, :c]
    box_preds = out[:p, c:5 * c]
    return cls_scores, box_preds


def rio_head_forward(head_params, feat, proposals, image_shape, target,
                     training=True, mode=None):
    """Forward pass of RIOHead.

    feat: (num_proposals, in_channels, 7, 7) pooled ROI features (NCHW).
    proposals: (num_proposals, 4); target: dict with 'bbox' (1,G,4), 'label' (1,G).
    """
    labels = None
    matched_gt_boxes = None
    if training and target is not None:
        gt_boxes = target["bbox"][0]
        gt_labels = target["label"][0]
        labels, matched_gt_boxes = assign_target_to_proposals(
            proposals, gt_boxes, gt_labels)

    x_flat = feat.reshape(feat.shape[0], -1).astype(jnp.float32)
    cls_scores, box_preds = mlp_head(x_flat, head_params, mode=mode)
    return cls_scores, box_preds, labels, matched_gt_boxes


# ----------------------------- main ----------------------------------------

if __name__ == "__main__":
    num_classes = 5
    in_channels = 4
    pool_size = 7
    num_proposals = 16
    num_gt = 8
    image_shape = (64, 64)

    key = jax.random.PRNGKey(0)
    k_param, k_feat, k_prop, k_gt, k_lab = jax.random.split(key, 5)

    params = init_params(k_param, num_classes, in_channels, pool_size)
    head_params = prepare_head_params(params, num_classes)

    feat = jax.random.normal(
        k_feat, (num_proposals, in_channels, pool_size, pool_size), jnp.float32)

    def make_boxes(k, n, img=64.0):
        k1, k2 = jax.random.split(k)
        xy1 = jax.random.uniform(k1, (n, 2), minval=0.0, maxval=img * 0.6)
        wh = jax.random.uniform(k2, (n, 2), minval=4.0, maxval=img * 0.4)
        return jnp.concatenate([xy1, xy1 + wh], axis=1).astype(jnp.float32)

    proposals = make_boxes(k_prop, num_proposals)
    gt_boxes = make_boxes(k_gt, num_gt)
    gt_labels = jax.random.randint(k_lab, (num_gt,), 1, num_classes, jnp.int32)

    target = {"bbox": gt_boxes[None, ...], "label": gt_labels[None, ...]}

    # Auto path (resident-w6 at these sizes).
    cls_scores, box_preds, labels, matched = rio_head_forward(
        head_params, feat, proposals, image_shape, target, training=True)
    jax.block_until_ready((cls_scores, box_preds, labels, matched))

    assert cls_scores.shape == (num_proposals, num_classes)
    assert box_preds.shape == (num_proposals, num_classes * 4)
    assert labels.shape == (num_proposals,)
    assert matched.shape == (num_proposals, 4)

    # ---- reference checks (pure JAX) -------------------------------------
    x_flat = feat.reshape(num_proposals, -1)
    ref_h = jnp.maximum(x_flat @ params["w6"] + params["b6"], 0.0)
    ref_h = jnp.maximum(ref_h @ params["w7"] + params["b7"], 0.0)
    ref_cls = ref_h @ params["wc"] + params["bc"]
    ref_box = ref_h @ params["wb"] + params["bb"]
    assert bool(jnp.allclose(cls_scores, ref_cls, atol=3e-2, rtol=5e-2)), \
        "cls head mismatch vs f32 reference (resident path)"
    assert bool(jnp.allclose(box_preds, ref_box, atol=3e-2, rtol=5e-2)), \
        "box head mismatch vs f32 reference (resident path)"

    # Exercise the K-tiled fallback path too (the v7x / won't-fit variant).
    cls_kt, box_kt = mlp_head(x_flat, head_params, mode="ktiled")
    jax.block_until_ready((cls_kt, box_kt))
    assert bool(jnp.allclose(cls_kt, ref_cls, atol=3e-2, rtol=5e-2)), \
        "cls head mismatch vs f32 reference (ktiled path)"
    assert bool(jnp.allclose(box_kt, ref_box, atol=3e-2, rtol=5e-2)), \
        "box head mismatch vs f32 reference (ktiled path)"

    a1 = (gt_boxes[:, 2] - gt_boxes[:, 0]) * (gt_boxes[:, 3] - gt_boxes[:, 1])
    a2 = (proposals[:, 2] - proposals[:, 0]) * (proposals[:, 3] - proposals[:, 1])
    xl = jnp.maximum(gt_boxes[:, None, 0], proposals[None, :, 0])
    yt = jnp.maximum(gt_boxes[:, None, 1], proposals[None, :, 1])
    xr = jnp.minimum(gt_boxes[:, None, 2], proposals[None, :, 2])
    yb = jnp.minimum(gt_boxes[:, None, 3], proposals[None, :, 3])
    inter = jnp.clip(xr - xl, 0.0) * jnp.clip(yb - yt, 0.0)
    union = a1[:, None] + a2[None, :] - inter
    ref_iou = inter / jnp.maximum(union, 1e-9)
    ref_best = ref_iou.max(axis=0)
    ref_idx = ref_iou.argmax(axis=0).astype(jnp.int32)
    ref_bg = (ref_best < IOU_THRESHOLD) & (ref_best >= LOW_BG_IOU)
    ref_ign = ref_best < LOW_BG_IOU
    ref_idx = jnp.where(ref_bg, -1, jnp.where(ref_ign, -2, ref_idx))
    ref_matched = gt_boxes[jnp.clip(ref_idx, 0, None)]
    ref_labels = gt_labels[jnp.clip(ref_idx, 0, None)].astype(jnp.int32)
    ref_labels = jnp.where(ref_bg, 0, jnp.where(ref_ign, -1, ref_labels))
    assert bool(jnp.all(labels == ref_labels)), "label assignment mismatch"
    assert bool(jnp.allclose(matched, ref_matched)), "matched gt boxes mismatch"

    print("KERNEL_OK")
</pallas_src>

<mosaic_0001>
module attributes {stable_mosaic.version = 11 : i64} {
  func.func @_iou_assign_kernel(%arg0: i32, %arg1: memref<8x4xf32, #tpu.memory_space<vmem>>, %arg2: memref<4x128xf32, #tpu.memory_space<vmem>>, %arg3: memref<1x128xf32, #tpu.memory_space<vmem>>, %arg4: memref<1x128xi32, #tpu.memory_space<vmem>>) attributes {dimension_semantics = [#tpu.dimension_semantics<parallel>], iteration_bounds = array<i64: 1>, scalar_prefetch = 0 : i64, scratch_operands = 0 : i64, tpu.core_type = #tpu.core_type<tc>, window_params = [{pipeline_mode = #tpu.pipeline_mode<synchronous>, transform_indices = @transform_0, window_bounds = array<i64: 8, 4>}, {transform_indices = @transform_1, window_bounds = array<i64: 4, 128>}, {transform_indices = @transform_2, window_bounds = array<i64: 1, 128>}, {transform_indices = @transform_3, window_bounds = array<i64: 1, 128>}]} {
    %c0 = arith.constant 0 : index
    %c0_0 = arith.constant 0 : index
    %0 = vector.load %arg1[%c0, %c0_0] : memref<8x4xf32, #tpu.memory_space<vmem>>, vector<8x4xf32>
    %c0_1 = arith.constant 0 : index
    %c0_2 = arith.constant 0 : index
    %1 = vector.load %arg2[%c0_1, %c0_2] : memref<4x128xf32, #tpu.memory_space<vmem>>, vector<4x128xf32>
    %2 = vector.extract_strided_slice %0 {offsets = [0, 2], sizes = [8, 1], strides = [1, 1]} : vector<8x4xf32> to vector<8x1xf32>
    %3 = vector.extract_strided_slice %0 {offsets = [0, 0], sizes = [8, 1], strides = [1, 1]} : vector<8x4xf32> to vector<8x1xf32>
    %4 = arith.subf %2, %3 : vector<8x1xf32>
    %5 = vector.extract_strided_slice %0 {offsets = [0, 3], sizes = [8, 1], strides = [1, 1]} : vector<8x4xf32> to vector<8x1xf32>
    %6 = vector.extract_strided_slice %0 {offsets = [0, 1], sizes = [8, 1], strides = [1, 1]} : vector<8x4xf32> to vector<8x1xf32>
    %7 = arith.subf %5, %6 : vector<8x1xf32>
    %8 = arith.mulf %4, %7 : vector<8x1xf32>
    %9 = vector.extract_strided_slice %1 {offsets = [2, 0], sizes = [1, 128], strides = [1, 1]} : vector<4x128xf32> to vector<1x128xf32>
    %10 = vector.extract_strided_slice %1 {offsets = [0, 0], sizes = [1, 128], strides = [1, 1]} : vector<4x128xf32> to vector<1x128xf32>
    %11 = arith.subf %9, %10 : vector<1x128xf32>
    %12 = vector.extract_strided_slice %1 {offsets = [3, 0], sizes = [1, 128], strides = [1, 1]} : vector<4x128xf32> to vector<1x128xf32>
    %13 = vector.extract_strided_slice %1 {offsets = [1, 0], sizes = [1, 128], strides = [1, 1]} : vector<4x128xf32> to vector<1x128xf32>
    %14 = arith.subf %12, %13 : vector<1x128xf32>
    %15 = arith.mulf %11, %14 : vector<1x128xf32>
    %16 = vector.extract_strided_slice %0 {offsets = [0, 0], sizes = [8, 1], strides = [1, 1]} : vector<8x4xf32> to vector<8x1xf32>
    %17 = vector.extract_strided_slice %1 {offsets = [0, 0], sizes = [1, 128], strides = [1, 1]} : vector<4x128xf32> to vector<1x128xf32>
    %18 = vector.broadcast %16 : vector<8x1xf32> to vector<8x128xf32>
    %19 = vector.broadcast %17 : vector<1x128xf32> to vector<8x128xf32>
    %20 = arith.maximumf %18, %19 : vector<8x128xf32>
    %21 = vector.extract_strided_slice %0 {offsets = [0, 1], sizes = [8, 1], strides = [1, 1]} : vector<8x4xf32> to vector<8x1xf32>
    %22 = vector.extract_strided_slice %1 {offsets = [1, 0], sizes = [1, 128], strides = [1, 1]} : vector<4x128xf32> to vector<1x128xf32>
    %23 = vector.broadcast %21 : vector<8x1xf32> to vector<8x128xf32>
    %24 = vector.broadcast %22 : vector<1x128xf32> to vector<8x128xf32>
    %25 = arith.maximumf %23, %24 : vector<8x128xf32>
    %26 = vector.extract_strided_slice %0 {offsets = [0, 2], sizes = [8, 1], strides = [1, 1]} : vector<8x4xf32> to vector<8x1xf32>
    %27 = vector.extract_strided_slice %1 {offsets = [2, 0], sizes = [1, 128], strides = [1, 1]} : vector<4x128xf32> to vector<1x128xf32>
    %28 = vector.broadcast %26 : vector<8x1xf32> to vector<8x128xf32>
    %29 = vector.broadcast %27 : vector<1x128xf32> to vector<8x128xf32>
    %30 = arith.minimumf %28, %29 : vector<8x128xf32>
    %31 = vector.extract_strided_slice %0 {offsets = [0, 3], sizes = [8, 1], strides = [1, 1]} : vector<8x4xf32> to vector<8x1xf32>
    %32 = vector.extract_strided_slice %1 {offsets = [3, 0], sizes = [1, 128], strides = [1, 1]} : vector<4x128xf32> to vector<1x128xf32>
    %33 = vector.broadcast %31 : vector<8x1xf32> to vector<8x128xf32>
    %34 = vector.broadcast %32 : vector<1x128xf32> to vector<8x128xf32>
    %35 = arith.minimumf %33, %34 : vector<8x128xf32>
    %36 = arith.subf %30, %20 : vector<8x128xf32>
    %cst = arith.constant 0.000000e+00 : f32
    %37 = vector.broadcast %cst : f32 to vector<8x128xf32>
    %38 = arith.maximumf %36, %37 : vector<8x128xf32>
    %39 = arith.subf %35, %25 : vector<8x128xf32>
    %cst_3 = arith.constant 0.000000e+00 : f32
    %40 = vector.broadcast %cst_3 : f32 to vector<8x128xf32>
    %41 = arith.maximumf %39, %40 : vector<8x128xf32>
    %42 = arith.mulf %38, %41 : vector<8x128xf32>
    %43 = vector.broadcast %8 : vector<8x1xf32> to vector<8x128xf32>
    %44 = vector.broadcast %15 : vector<1x128xf32> to vector<8x128xf32>
    %45 = arith.addf %43, %44 : vector<8x128xf32>
    %46 = arith.subf %45, %42 : vector<8x128xf32>
    %cst_4 = arith.constant 9.99999971E-10 : f32
    %47 = vector.broadcast %cst_4 : f32 to vector<8x128xf32>
    %48 = arith.maximumf %46, %47 : vector<8x128xf32>
    %49 = arith.divf %42, %48 : vector<8x128xf32>
    %cst_5 = arith.constant dense<0xFF800000> : vector<128xf32>
    %50 = vector.multi_reduction <maximumf>, %49, %cst_5 [0] : vector<8x128xf32> to vector<128xf32>
    %51 = vector.shape_cast %50 : vector<128xf32> to vector<1x128xf32>
    %52 = tpu.iota {dimensions = array<i32: 0>} : vector<8x128xi32>
    %53 = arith.sitofp %52 : vector<8x128xi32> to vector<8x128xf32>
    %54 = vector.broadcast %51 : vector<1x128xf32> to vector<8x128xf32>
    %55 = arith.cmpf oge, %49, %54 : vector<8x128xf32>
    %cst_6 = arith.constant 1.000000e+09 : f32
    %56 = vector.broadcast %cst_6 : f32 to vector<8x128xf32>
    %57 = arith.select %55, %53, %56 : vector<8x128xi1>, vector<8x128xf32>
    %c0_7 = arith.constant 0 : index
    %c0_8 = arith.constant 0 : index
    %58 = vector.load %arg3[%c0_7, %c0_8] : memref<1x128xf32, #tpu.memory_space<vmem>>, vector<1x128xf32>
    tpu.vector_store %arg3[%c0_7, %c0_8], %51 {strides = array<i32>} : memref<1x128xf32, #tpu.memory_space<vmem>>, vector<1x128xf32>,
    %cst_9 = arith.constant dense<0x7F800000> : vector<128xf32>
    %59 = vector.multi_reduction <minimumf>, %57, %cst_9 [0] : vector<8x128xf32> to vector<128xf32>
    %60 = vector.shape_cast %59 : vector<128xf32> to vector<1x128xf32>
    %61 = arith.fptosi %60 : vector<1x128xf32> to vector<1x128xi32>
    %c0_10 = arith.constant 0 : index
    %c0_11 = arith.constant 0 : index
    %62 = vector.load %arg4[%c0_10, %c0_11] : memref<1x128xi32, #tpu.memory_space<vmem>>, vector<1x128xi32>
    tpu.vector_store %arg4[%c0_10, %c0_11], %61 {strides = array<i32>} : memref<1x128xi32, #tpu.memory_space<vmem>>, vector<1x128xi32>,
    return
  }
  func.func @transform_0(%arg0: i32) -> (i32, i32) {
    %c0_i32 = arith.constant 0 : i32
    %c0_i32_0 = arith.constant 0 : i32
    %c0_i32_1 = arith.constant 0 : i32
    return %c0_i32, %c0_i32_0 : i32, i32
  }
  func.func @transform_1(%arg0: i32) -> (i32, i32) {
    %c0_i32 = arith.constant 0 : i32
    %c0_i32_0 = arith.constant 0 : i32
    return %c0_i32, %arg0 : i32, i32
  }
  func.func @transform_2(%arg0: i32) -> (i32, i32) {
    %c0_i32 = arith.constant 0 : i32
    %c0_i32_0 = arith.constant 0 : i32
    return %c0_i32, %arg0 : i32, i32
  }
  func.func @transform_3(%arg0: i32) -> (i32, i32) {
    %c0_i32 = arith.constant 0 : i32
    %c0_i32_0 = arith.constant 0 : i32
    return %c0_i32, %arg0 : i32, i32
  }
}

</mosaic_0001>

<bundles_post_ra>
// kernel: tpu_custom_call.1
= control target key start
LH: loop header
LB: loop body
LE: loop exit
PB: predicated region body
PF: predicated region fallthrough
CT: control target
= control target key end

     0   :  { %9 = vsyncpa [#allocation3], 0  ;;  %s252_s0 = inlined_call_operand.vmem [shape: f32[8,4], index: 0, kind: input, shape index: {}]   ;;  %s253_s1 = inlined_call_operand.vmem [shape: f32[4,128], index: 1, kind: input, shape index: {}]   ;;  %s254_s2 = inlined_call_operand.hbm [shape: f32[1,128], index: 2, kind: output, shape index: {0}]   ;;  %s255_s3 = inlined_call_operand.hbm [shape: s32[1,128], index: 3, kind: output, shape index: {1}]  }
   0x1   :  { %v15_v0 = vld [vmem:[%s252_s0] sm:$0xff] }
   0x2   :  { %10 = vsyncpa [#allocation5], 0  ;;  %s212_s14 = smov 2   ;;  %v213_v1 = vmov 0   ;;  %v214_v2 = vmov 1   ;;  %s215_s15 = smov 127   ;;  %v94_v48 = vlaneseq }
   0x3   :  { %18 = vrot.lane.b32.xlu0 %v15_v0, %s212_s14  ;;  %153 = vset.pattern.permute.xlu1 %v213_v1  ;;  %v216_v5 = vmov 2   ;;  %v217_v6 = vmov 3   ;;  %v16_v11 = vld [vmem:[%s253_s1] sm:$0xf]  ;;  %s218_s1 = smov [#allocation2]   ;;  %s115_s20 = sshll.u32 %s254_s2, 4  ;;  %s116_s20 = int_to_ptr.hbm [resolvable:$true] %s115_s20 }
   0x4   :  { %36 = vperm.xlu1 %153, %v15_v0   ;;  %157 = vset.pattern.permute.xlu0 %v216_v5  ;;  %v28_v12 = vrot.slane %v16_v11, 6  ;;  %v39_v13 = vperm.slane %v16_v11, 0  ;;  %v51_v14 = vperm.slane %v16_v11, 2  ;;  %v57_v15 = vperm.slane %v16_v11, 3  ;;  %s113_s17 = sshll.u32 %s218_s1, 4  ;;  %s219_s21 = smov [#allocation4]   ;;  %s114_s17 = int_to_ptr.vmem [resolvable:$true] %s113_s17 }
   0x5   :  { %155 = vset.pattern.permute.xlu2 %v216_v5  ;;  %v45_v16 = vperm.slane %v16_v11, 1  ;;  %v95_v51 = vshrl.u32 %v94_v48, 7  ;;  %s124_s2 = sshll.u32 %s219_s21, 4  ;;  %s126_s24 = sshll.u32 %s255_s3, 4  ;;  %s125_s2 = int_to_ptr.vmem [resolvable:$true] %s124_s2  ;;  %s127_s24 = int_to_ptr.hbm [resolvable:$true] %s126_s24 }
   0x6   :  { %48 = vperm.xlu2 %155, %v15_v0   ;;  %v30_v17 = vsub.f32 %v16_v11, %v28_v12 }
   0x7   :  { %v96_v54 = vcvt.s32.f32 %v95_v51 }
   0x8   :  { %v32_v24 = vrot.slane %v30_v17, 1 }
   0xa   :  { %v34_v27 = vmul.f32 %v32_v24, %v30_v17 }
   0xc   :  { %154 = vset.pattern.permute.xlu1 %v214_v2  ;;  %v69_v30 = vperm.slane %v34_v27, 2 }
   0xd   :  { %42 = vperm.xlu1 %154, %v15_v0  }
   0xe   :  { %156 = vset.pattern.permute.xlu2 %v217_v6 }
   0xf   :  { %54 = vperm.xlu2 %156, %v15_v0  }
  0x60   :  { %v49_v9 = vpop.permute.xlu2 %48 }
  0x61   :  { %v52_v21 = vmin.f32 %v49_v9, %v51_v14 }
  0x69   :  { %v55_v18 = vpop.permute.xlu2 %54 }
  0x6a   :  { %v58_v22 = vmin.f32 %v55_v18, %v57_v15 }
  0x75   :  { %v19_v3 = vpop.permute.xlu0 %18 }
  0x76   :  { %v21_v4 = vsub.f32 %v15_v0, %v19_v3  ;;  %v37_v10 = vpop.permute.xlu1 %36 }
  0x77   :  { %v40_v20 = vmax.f32 %v37_v10, %v39_v13 }
  0x78   :  { %23 = vrot.lane.b32.xlu0 %v21_v4, %s215_s15 }
  0x79   :  { %v59_v25 = vsub.f32 %v52_v21, %v40_v20 }
  0x7b   :  { %v60_v28 = vmax.f32 %v59_v25, 0.0 }
  0x7f   :  { %v43_v19 = vpop.permute.xlu1 %42 }
  0x80   :  { %v46_v23 = vmax.f32 %v43_v19, %v45_v16 }
  0x82   :  { %v61_v26 = vsub.f32 %v58_v22, %v46_v23 }
  0x84   :  { %v62_v29 = vmax.f32 %v61_v26, 0.0 }
  0x86   :  { %v63_v32 = vmul.f32 %v62_v29, %v60_v28 }
  0xea   :  { %v24_v7 = vpop.permute.xlu0 %23 }
  0xeb   :  { %v26_v8 = vmul.f32 %v24_v7, %v21_v4 }
  0xed   :  { %66 = vperm.xlu0 %157, %v26_v8  }
 0x15f   :  { %v67_v31 = vpop.permute.xlu0 %66 }
 0x160   :  { %v70_v33 = vadd.f32 %v69_v30, %v67_v31 }
 0x162   :  { %v71_v34 = vsub.f32 %v70_v33, %v63_v32 }
 0x164   :  { %v72_v35 = vmax.f32 %v71_v34, 1e-09 }
 0x166   :  { %158 = vrcp.f32 %v72_v35  ;;  %v84_v39 = vand.u32 2147483648, %v72_v35  ;;  %v82_v41 = vand.u32 2147483647, %v72_v35  ;;  %vm78_vm1 = vweird.f32 %v72_v35 }
 0x168   :  { %v85_v43 = vor.u32 1.1754944e-38, %v84_v39  ;;  %vm83_vm3 = vcmp.eq.f32.partialorder %v82_v41, 8.507059e+37 }
 0x16c   :  { %v159_v36 = vpop.eup %158 }
 0x16d   :  { %v74_v37 = vmul.f32 %v159_v36, %v72_v35  ;;  %vm79_vm0 = vweird.f32 %v159_v36 }
 0x16e   :  { %vm80_vm2 = vmor %vm78_vm1, %vm79_vm0 }
 0x16f   :  { %v75_v38 = vsub.f32 1.0, %v74_v37 }
 0x171   :  { %v76_v40 = vmul.f32 %v159_v36, %v75_v38 }
 0x173   :  { %v77_v42 = vadd.f32 %v159_v36, %v76_v40 }
 0x175   :  { %v81_v44 = vsel %vm80_vm2, %v159_v36, %v77_v42 }
 0x176   :  { %v86_v45 = vsel %vm83_vm3, %v85_v43, %v81_v44 }
 0x177   :  { %v87_v46 = vmul.f32 %v86_v45, %v63_v32 }
 0x179   :  { %v88_v47 = vrot.slane %v87_v46, 4 }
 0x17b   :  { %v89_v49 = vmax.f32 %v87_v46, %v88_v47 }
 0x17d   :  { %v90_v50 = vrot.slane %v89_v49, 2 }
 0x17f   :  { %v91_v52 = vmax.f32 %v89_v49, %v90_v50 }
 0x181   :  { %v92_v53 = vrot.slane %v91_v52, 1 }
 0x183   :  { %v93_v55 = vmax.f32 %v91_v52, %v92_v53 }
 0x185   :  { %vm97_vm4 = vcmp.ge.f32.partialorder %v87_v46, %v93_v55  ;;  %99 = vst [vmem:[#allocation2] sm:$0x1] %v93_v55 }
 0x186   :  { %v98_v56 = vsel %vm97_vm4, %v96_v54, 1e+09  ;;  %118 = dma.vmem_to_hbm [thread:$0]  %s114_s17, 16, %s116_s20, [#allocation3]  }
 0x187   :  { %v100_v57 = vrot.slane %v98_v56, 4 }
 0x189   :  { %v101_v58 = vmin.f32 %v98_v56, %v100_v57 }
 0x18b   :  { %v102_v59 = vrot.slane %v101_v58, 2 }
 0x18d   :  { %v103_v60 = vmin.f32 %v101_v58, %v102_v59 }
 0x18f   :  { %v104_v61 = vrot.slane %v103_v60, 1 }
 0x191   :  { %v105_v62 = vmin.f32 %v103_v60, %v104_v61 }
 0x193   :  { %vm140_vm5 = vcmp.lt.s32.totalorder %v105_v62, 0  ;;  %v141_v63 = vceil.f32 %v105_v62  ;;  %v142_v0 = vfloor.f32 %v105_v62 }
 0x195   :  { %v143_v1 = vsel %vm140_vm5, %v141_v63, %v142_v0 }
 0x196   :  { %v144_v2 = vcvt.f32.s32 %v143_v1 }
 0x198   :  { %107 = vst [vmem:[#allocation4] sm:$0x1] %v144_v2 }
 0x199   :  { %129 = dma.vmem_to_hbm [thread:$0]  %s125_s2, 16, %s127_s24, [#allocation5]  }
 0x19a   :  { %208 = dma.done.wait [#allocation3], 16  }
 0x19b   :  { %209 = vsyncadd [#allocation3], 4294967280 }
 0x19c   :  { %210 = dma.done.wait [#allocation5], 16  }
 0x19d   :  { %211 = vsyncadd [#allocation5], 4294967280 }
 0x19e   :  { %138 = vsyncpa [#allocation3], 1 }
 0x19f   :  { %139 = vsyncpa [#allocation5], 1 }

</bundles_post_ra>
